<compile_context>
chip_gen: v5e
topology: v5e:2x2
jax: 0.10.0
libtpu: 0.0.40
codegen_flags: <defaults>
</compile_context>

<pallas_src>
import math

import jax
import jax.numpy as jnp
from jax.experimental import pallas as pl
from jax.experimental.pallas import tpu as pltpu  # noqa: F401  (TPU backend)


def au_gcn_kernel(a_ref, mask_ref, x_ref, w1_ref, b1_ref, w2_ref, b2_ref,
                  out_ref):
    N = a_ref.shape[0]
    BN = x_ref.shape[0]
    B = BN // N

    # Batch-invariant binarized adjacency -- computed once per call.
    # (round-half-to-even matches torch.round; sigmoid(0) = 0.5 -> 0.)
    adj = jnp.round(jax.nn.sigmoid(a_ref[...] * mask_ref[...]))       # (N, N)

    x = x_ref[...]                                                    # (B*N, F)

    # ---- Layer 1: relu(adj @ (x @ W1) + b1) ------------------------------
    # Weight matmul folded over the batch (dense M dim on the MXU).
    s1 = jnp.dot(x, w1_ref[...], preferred_element_type=jnp.float32)  # (B*N, H)

    # Per-graph adjacency application: B small (N,N)@(N,H) matmuls on
    # statically sliced row blocks (optimal O(B*N^2*H) flops, no block-diag).
    h1_parts = [
        jnp.dot(adj, s1[j * N:(j + 1) * N, :],
                preferred_element_type=jnp.float32)
        for j in range(B)
    ]
    h1 = jnp.concatenate(h1_parts, axis=0) + b1_ref[...]              # (B*N, H)
    h1 = jnp.maximum(h1, 0.0)

    # ---- Layer 2: adj @ (h1 @ W2) + b2 -----------------------------------
    s2 = jnp.dot(h1, w2_ref[...], preferred_element_type=jnp.float32)  # (B*N, C)

    for j in range(B):
        blk = jnp.dot(adj, s2[j * N:(j + 1) * N, :],
                      preferred_element_type=jnp.float32) + b2_ref[...]
        out_ref[j * N:(j + 1) * N, :] = blk.astype(out_ref.dtype)     # (N, C)


def au_gcn_forward(x, A, mask, w1, b1, w2, b2):
    """x: (B, N, nfeat) -> (B, N * nclass)"""
    B, N, F_in = x.shape
    H = w1.shape[1]
    C = w2.shape[1]
    BN = B * N

    x2d = x.reshape(BN, F_in)       # fold batch into the matmul M dimension
    b1_2d = b1.reshape(1, H)
    b2_2d = b2.reshape(1, C)

    flops = 2 * (BN * F_in * H + B * N * N * H + BN * H * C + B * N * N * C)
    bytes_accessed = 4 * (x.size + A.size + mask.size + w1.size + b1.size
                          + w2.size + b2.size + BN * C)
    cost = pl.CostEstimate(flops=flops, transcendentals=N * N,
                           bytes_accessed=bytes_accessed)

    # Single invocation (no grid): every operand is a whole-array VMEM block,
    # so there is no per-step pipelining overhead and weights/adjacency are
    # resident exactly once (no redundant double-buffering of constants).
    out2d = pl.pallas_call(
        au_gcn_kernel,
        out_shape=jax.ShapeDtypeStruct((BN, C), x.dtype),
        cost_estimate=cost,
    )(A, mask, x2d, w1, b1_2d, w2, b2_2d)

    # x = x.view(x.size(0), -1): free row-major reshape in the wrapper.
    return out2d.reshape(B, N * C)


def init_params(key, nfeat, nhid, nclass, n_nodes):
    """Deterministic init matching GraphConvolution.reset_parameters."""
    k = jax.random.split(key, 6)
    stdv1 = 1.0 / math.sqrt(nhid)
    stdv2 = 1.0 / math.sqrt(nclass)
    w1 = jax.random.uniform(k[0], (nfeat, nhid), jnp.float32, -stdv1, stdv1)
    b1 = jax.random.uniform(k[1], (nhid,), jnp.float32, -stdv1, stdv1)
    w2 = jax.random.uniform(k[2], (nhid, nclass), jnp.float32, -stdv2, stdv2)
    b2 = jax.random.uniform(k[3], (nclass,), jnp.float32, -stdv2, stdv2)
    # Learnable adjacency A and fixed binary mask.
    A = jax.random.normal(k[4], (n_nodes, n_nodes), jnp.float32)
    mask = (jax.random.uniform(k[5], (n_nodes, n_nodes)) > 0.5).astype(
        jnp.float32)
    return A, mask, w1, b1, w2, b2


def reference_forward(x, A, mask, w1, b1, w2, b2):
    """Pure-JAX reference (mirrors the PyTorch forward)."""
    adj = jnp.round(jax.nn.sigmoid(A * mask))
    outs = []
    for j in range(x.shape[0]):
        t = jnp.maximum(adj @ (x[j] @ w1) + b1, 0.0)
        t = adj @ (t @ w2) + b2
        outs.append(t)
    out = jnp.stack(outs, axis=0)
    return out.reshape(out.shape[0], -1)


if __name__ == "__main__":
    # Small shapes: batch=2, num AU nodes=8, nfeat=32, nhid=16, nclass=4.
    B, N, NFEAT, NHID, NCLASS = 2, 8, 32, 16, 4

    key = jax.random.PRNGKey(0)
    kx, kp = jax.random.split(key)
    x = jax.random.normal(kx, (B, N, NFEAT), jnp.float32)
    A, mask, w1, b1, w2, b2 = init_params(kp, NFEAT, NHID, NCLASS, N)

    out = au_gcn_forward(x, A, mask, w1, b1, w2, b2)
    out = jax.block_until_ready(out)

    ref = reference_forward(x, A, mask, w1, b1, w2, b2)
    assert out.shape == (B, N * NCLASS), out.shape
    assert jnp.allclose(out, ref, atol=1e-5, rtol=1e-5), (
        float(jnp.max(jnp.abs(out - ref))))

    print("KERNEL_OK")
</pallas_src>

<mosaic_0001>
module attributes {stable_mosaic.version = 11 : i64} {
  func.func @au_gcn_kernel(%arg0: memref<8x8xf32, #tpu.memory_space<vmem>>, %arg1: memref<8x8xf32, #tpu.memory_space<vmem>>, %arg2: memref<16x32xf32, #tpu.memory_space<vmem>>, %arg3: memref<32x16xf32, #tpu.memory_space<vmem>>, %arg4: memref<1x16xf32, #tpu.memory_space<vmem>>, %arg5: memref<16x4xf32, #tpu.memory_space<vmem>>, %arg6: memref<1x4xf32, #tpu.memory_space<vmem>>, %arg7: memref<16x4xf32, #tpu.memory_space<vmem>>) attributes {dimension_semantics = [], scalar_prefetch = 0 : i64, scratch_operands = 0 : i64, tpu.core_type = #tpu.core_type<tc>} {
    %c0 = arith.constant 0 : index
    %c0_0 = arith.constant 0 : index
    %0 = vector.load %arg0[%c0, %c0_0] : memref<8x8xf32, #tpu.memory_space<vmem>>, vector<8x8xf32>
    %c0_1 = arith.constant 0 : index
    %c0_2 = arith.constant 0 : index
    %1 = vector.load %arg1[%c0_1, %c0_2] : memref<8x8xf32, #tpu.memory_space<vmem>>, vector<8x8xf32>
    %2 = arith.mulf %0, %1 : vector<8x8xf32>
    %3 = arith.negf %2 : vector<8x8xf32>
    %4 = math.exp %3 : vector<8x8xf32>
    %cst = arith.constant 1.000000e+00 : f32
    %5 = vector.broadcast %cst : f32 to vector<8x8xf32>
    %6 = arith.addf %5, %4 : vector<8x8xf32>
    %7 = arith.divf %5, %6 : vector<8x8xf32>
    %8 = math.roundeven %7 : vector<8x8xf32>
    %c0_3 = arith.constant 0 : index
    %c0_4 = arith.constant 0 : index
    %9 = vector.load %arg2[%c0_3, %c0_4] : memref<16x32xf32, #tpu.memory_space<vmem>>, vector<16x32xf32>
    %c0_5 = arith.constant 0 : index
    %c0_6 = arith.constant 0 : index
    %10 = vector.load %arg3[%c0_5, %c0_6] : memref<32x16xf32, #tpu.memory_space<vmem>>, vector<32x16xf32>
    %cst_7 = arith.constant dense<0.000000e+00> : vector<16x16xf32>
    %11 = tpu.matmul %9, %10, %cst_7 {dimension_numbers = #tpu.dot_dimension_numbers<[1], [0], [0], [1], [0, 0, 1, 1], [], []>} : vector<16x32xf32>, vector<32x16xf32>, vector<16x16xf32> -> vector<16x16xf32>
    %12 = vector.extract_strided_slice %11 {offsets = [0, 0], sizes = [8, 16], strides = [1, 1]} : vector<16x16xf32> to vector<8x16xf32>
    %cst_8 = arith.constant dense<0.000000e+00> : vector<8x16xf32>
    %13 = tpu.matmul %8, %12, %cst_8 {dimension_numbers = #tpu.dot_dimension_numbers<[1], [0], [0], [1], [0, 0, 1, 1], [], []>} : vector<8x8xf32>, vector<8x16xf32>, vector<8x16xf32> -> vector<8x16xf32>
    %14 = vector.extract_strided_slice %11 {offsets = [8, 0], sizes = [8, 16], strides = [1, 1]} : vector<16x16xf32> to vector<8x16xf32>
    %cst_9 = arith.constant dense<0.000000e+00> : vector<8x16xf32>
    %15 = tpu.matmul %8, %14, %cst_9 {dimension_numbers = #tpu.dot_dimension_numbers<[1], [0], [0], [1], [0, 0, 1, 1], [], []>} : vector<8x8xf32>, vector<8x16xf32>, vector<8x16xf32> -> vector<8x16xf32>
    %16 = tpu.concatenate %13, %15 in 0 : vector<8x16xf32>, vector<8x16xf32> -> vector<16x16xf32>
    %c0_10 = arith.constant 0 : index
    %c0_11 = arith.constant 0 : index
    %17 = vector.load %arg4[%c0_10, %c0_11] : memref<1x16xf32, #tpu.memory_space<vmem>>, vector<1x16xf32>
    %18 = vector.broadcast %17 : vector<1x16xf32> to vector<16x16xf32>
    %19 = arith.addf %16, %18 : vector<16x16xf32>
    %cst_12 = arith.constant 0.000000e+00 : f32
    %20 = vector.broadcast %cst_12 : f32 to vector<16x16xf32>
    %21 = arith.maximumf %19, %20 : vector<16x16xf32>
    %c0_13 = arith.constant 0 : index
    %c0_14 = arith.constant 0 : index
    %22 = vector.load %arg5[%c0_13, %c0_14] : memref<16x4xf32, #tpu.memory_space<vmem>>, vector<16x4xf32>
    %cst_15 = arith.constant dense<0.000000e+00> : vector<16x4xf32>
    %23 = tpu.matmul %21, %22, %cst_15 {dimension_numbers = #tpu.dot_dimension_numbers<[1], [0], [0], [1], [0, 0, 1, 1], [], []>} : vector<16x16xf32>, vector<16x4xf32>, vector<16x4xf32> -> vector<16x4xf32>
    %24 = vector.extract_strided_slice %23 {offsets = [0, 0], sizes = [8, 4], strides = [1, 1]} : vector<16x4xf32> to vector<8x4xf32>
    %cst_16 = arith.constant dense<0.000000e+00> : vector<8x4xf32>
    %25 = tpu.matmul %8, %24, %cst_16 {dimension_numbers = #tpu.dot_dimension_numbers<[1], [0], [0], [1], [0, 0, 1, 1], [], []>} : vector<8x8xf32>, vector<8x4xf32>, vector<8x4xf32> -> vector<8x4xf32>
    %c0_17 = arith.constant 0 : index
    %c0_18 = arith.constant 0 : index
    %26 = vector.load %arg6[%c0_17, %c0_18] : memref<1x4xf32, #tpu.memory_space<vmem>>, vector<1x4xf32>
    %27 = vector.broadcast %26 : vector<1x4xf32> to vector<8x4xf32>
    %28 = arith.addf %25, %27 : vector<8x4xf32>
    %c0_19 = arith.constant 0 : index
    %c0_20 = arith.constant 0 : index
    %29 = vector.load %arg7[%c0_19, %c0_20] : memref<16x4xf32, #tpu.memory_space<vmem>>, vector<8x4xf32>
    tpu.vector_store %arg7[%c0_19, %c0_20], %28 {strides = array<i32>} : memref<16x4xf32, #tpu.memory_space<vmem>>, vector<8x4xf32>,
    %30 = vector.extract_strided_slice %23 {offsets = [8, 0], sizes = [8, 4], strides = [1, 1]} : vector<16x4xf32> to vector<8x4xf32>
    %cst_21 = arith.constant dense<0.000000e+00> : vector<8x4xf32>
    %31 = tpu.matmul %8, %30, %cst_21 {dimension_numbers = #tpu.dot_dimension_numbers<[1], [0], [0], [1], [0, 0, 1, 1], [], []>} : vector<8x8xf32>, vector<8x4xf32>, vector<8x4xf32> -> vector<8x4xf32>
    %c0_22 = arith.constant 0 : index
    %c0_23 = arith.constant 0 : index
    %32 = vector.load %arg6[%c0_22, %c0_23] : memref<1x4xf32, #tpu.memory_space<vmem>>, vector<1x4xf32>
    %33 = vector.broadcast %32 : vector<1x4xf32> to vector<8x4xf32>
    %34 = arith.addf %31, %33 : vector<8x4xf32>
    %c8 = arith.constant 8 : index
    %c0_24 = arith.constant 0 : index
    %35 = vector.load %arg7[%c8, %c0_24] : memref<16x4xf32, #tpu.memory_space<vmem>>, vector<8x4xf32>
    tpu.vector_store %arg7[%c8, %c0_24], %34 {strides = array<i32>} : memref<16x4xf32, #tpu.memory_space<vmem>>, vector<8x4xf32>,
    return
  }
}

</mosaic_0001>

<bundles_post_ra>
// kernel: tpu_custom_call.1
= control target key start
LH: loop header
LB: loop body
LE: loop exit
PB: predicated region body
PF: predicated region fallthrough
CT: control target
= control target key end

     0   :  { %vm55_vm0 = vcmask 261120   ;;  %vm85_vm6 = vcmask 64512   ;;  %vm139_vm7 = vcmask 130048   ;;  %vm193_vm8 = vcmask 31744   ;;  %s337_s3 = inlined_call_operand.vmem [shape: f32[32,16], index: 3, kind: input, shape index: {}]   ;;  %s338_s2 = inlined_call_operand.vmem [shape: f32[16,32], index: 2, kind: input, shape index: {}]   ;;  %s339_s4 = inlined_call_operand.vmem [shape: f32[1,16], index: 4, kind: input, shape index: {}]   ;;  %s340_s0 = inlined_call_operand.vmem [shape: f32[8,8], index: 0, kind: input, shape index: {}]   ;;  %s341_s1 = inlined_call_operand.vmem [shape: f32[8,8], index: 1, kind: input, shape index: {}]   ;;  %s342_s5 = inlined_call_operand.vmem [shape: f32[16,4], index: 5, kind: input, shape index: {}]   ;;  %s343_s6 = inlined_call_operand.vmem [shape: f32[1,4], index: 6, kind: input, shape index: {}]   ;;  %s344_s7 = inlined_call_operand.vmem [shape: f32[16,4], index: 7, kind: output, shape index: {}]  }
   0x1   :  { %v54_v0 = vld [vmem:[%s337_s3 + $0x18] sm:$0xff]  ;;  %v53_v1 = vld [vmem:[%s337_s3 + $0x10] sm:$0xff]  ;;  %v52_v2 = vld [vmem:[%s337_s3 + $0x8] sm:$0xff] }
   0x2   :  { %74 = vmatpush.msra.mxu0 %v54_v0  ;;  %v51_v3 = vld [vmem:[%s337_s3] sm:$0xff]  ;;  %v50_v5 = vld [vmem:[%s338_s2 + $0x8] sm:$0xff] }
   0x3   :  { %v49_v4 = vld [vmem:[%s338_s2] sm:$0xff]  ;;  %v138_v31 = vld [vmem:[%s342_s5 + $0x8] sm:$0xff] }
   0x4   :  { %75 = vmatpush.msra.mxu0 %v53_v1  ;;  %v26_v6 = vld [vmem:[%s340_s0] sm:$0xff]  ;;  %160 = vmatpush.msra.mxu3 %v138_v31 }
   0x5   :  { %v27_v7 = vld [vmem:[%s341_s1] sm:$0xff] }
   0x6   :  { %76 = vmatpush.msra.mxu0 %v52_v2  ;;  %v28_v8 = vmul.f32 %v27_v7, %v26_v6  ;;  %v137_v32 = vld [vmem:[%s342_s5] sm:$0xff] }
   0x7   :  { %161 = vmatpush.msra.mxu3 %v137_v32  ;;  %v241_v33 = vld [vmem:[%s339_s4] ss:$0 sm:$0xff] }
   0x8   :  { %77 = vmatpush.msra.mxu0 %v51_v3  ;;  %v224_v9 = vmul.f32 -1.442695, %v28_v8  ;;  %v242_v42 = vld [vmem:[%s343_s6] ss:$0 sm:$0xff] }
   0x9   :  { %225 = vmatmul.msk.f32.vlgmr.msra.gmra.mxu0 %vm55_vm0, %v49_v4  ;;  %v243_v45 = vld [vmem:[%s343_s6] ss:$0 sm:$0xff] }
   0xa   :  { %244 = vpow2.f32 %v224_v9 }
  0x10   :  { %v245_v10 = vpop.eup %244 }
  0x11   :  { %226 = vmatmul.msk.f32.gmra.mxu0 %vm55_vm0, %v50_v5  ;;  %v32_v11 = vadd.f32 1.0, %v245_v10 }
  0x13   :  { %246 = vrcp.f32 %v32_v11  ;;  %vm38_vm1 = vweird.f32 %v32_v11  ;;  %v44_v16 = vand.u32 2147483648, %v32_v11  ;;  %v42_v18 = vand.u32 2147483647, %v32_v11 }
  0x15   :  { %v45_v19 = vor.u32 1.1754944e-38, %v44_v16  ;;  %vm43_vm4 = vcmp.eq.f32.partialorder %v42_v18, 8.507059e+37 }
  0x19   :  { %v247_v12 = vpop.eup %246 }
  0x1a   :  { %v34_v13 = vmul.f32 %v247_v12, %v32_v11  ;;  %vm39_vm2 = vweird.f32 %v247_v12 }
  0x1b   :  { %vm40_vm3 = vmor %vm38_vm1, %vm39_vm2 }
  0x1c   :  { %v35_v14 = vsub.f32 1.0, %v34_v13 }
  0x1e   :  { %v36_v15 = vmul.f32 %v247_v12, %v35_v14 }
  0x20   :  { %v37_v17 = vadd.f32 %v247_v12, %v36_v15 }
  0x22   :  { %v41_v20 = vsel %vm40_vm3, %v247_v12, %v37_v17 }
  0x23   :  { %v46_v21 = vsel %vm43_vm4, %v45_v19, %v41_v20 }
  0x24   :  { %v235_v22 = vcvt.f32.s32 %v46_v21  ;;  %v238_v25 = vand.u32 2147483648, %v46_v21  ;;  %v233_v26 = vand.u32 2147483647, %v46_v21 }
  0x26   :  { %v236_v23 = vcvt.s32.f32 %v235_v22  ;;  %vm234_vm5 = vcmp.lt.f32.partialorder %v233_v26, 8388608.0 }
  0x28   :  { %v237_v24 = vand.u32 2147483647, %v236_v23 }
  0x2a   :  { %v239_v27 = vor.u32 %v238_v25, %v237_v24 }
  0x2c   :  { %v240_v28 = vsel %vm234_vm5, %v239_v27, %v46_v21 }
  0x86   :  { %v79_v29 = vpop.f32.mrf.mxu0 }
  0x87   :  { %104 = vmatpush.msra.mxu1 %v79_v29 }
  0x88   :  { %227 = vmatmul.msk.f32.vlgmr.msra.gmra.mxu1 %vm85_vm6, %v240_v28 }
  0x8e   :  { %v82_v30 = vpop.f32.mrf.mxu0 }
  0x8f   :  { %124 = vmatpush.msra.mxu2 %v82_v30 }
  0x90   :  { %228 = vmatmul.msk.f32.vlgmr.msra.gmra.mxu2 %vm85_vm6, %v240_v28 }
 0x105   :  { %v106_v34 = vpop.f32.mrf.mxu1 }
 0x106   :  { %v133_v35 = vadd.f32 %v241_v33, %v106_v34 }
 0x108   :  { %v135_v36 = vmax.f32 %v133_v35, 0.0 }
 0x10a   :  { %229 = vmatmul.msk.f32.vlgmr.msra.gmra.mxu3 %vm139_vm7, %v135_v36 }
 0x113   :  { %v126_v37 = vpop.f32.mrf.mxu2 }
 0x114   :  { %v134_v38 = vadd.f32 %v241_v33, %v126_v37 }
 0x116   :  { %v136_v39 = vmax.f32 %v134_v38, 0.0 }
 0x118   :  { %230 = vmatmul.msk.f32.gmra.mxu3 %vm139_vm7, %v136_v39 }
 0x18d   :  { %v163_v40 = vpop.f32.mrf.mxu3 }
 0x18e   :  { %188 = vmatpush.msrb.mxu1 %v163_v40 }
 0x18f   :  { %231 = vmatmul.msk.f32.vlgmr.msrb.gmra.mxu1 %vm85_vm6, %v240_v28 }
 0x19b   :  { %v166_v41 = vpop.f32.mrf.mxu3 }
 0x19c   :  { %214 = vmatpush.msrb.mxu2 %v166_v41 }
 0x19d   :  { %232 = vmatmul.msk.f32.vlgmr.msrb.gmra.mxu2 %vm85_vm6, %v240_v28 }
 0x20c   :  { %v190_v43 = vpop.f32.mrf.mxu1 }
 0x20d   :  { %v191_v44 = vadd.f32 %v242_v42, %v190_v43 }
 0x20f   :  { %194 = vst.msk [vmem:[%s344_s7] sm:$0xff] %vm193_vm8, %v191_v44 }
 0x220   :  { %v216_v46 = vpop.f32.mrf.mxu2 }
 0x221   :  { %v217_v47 = vadd.f32 %v243_v45, %v216_v46 }
 0x223   :  { %219 = vst.msk [vmem:[%s344_s7 + $0x8] sm:$0xff] %vm193_vm8, %v217_v47 }

</bundles_post_ra>
